<compile_context>
chip_gen: v7x
topology: tpu7x:2x2x1
jax: 0.10.0
libtpu: 0.0.40
codegen_flags: <defaults>
</compile_context>

<pallas_src>
import functools
import numpy as np

import jax
import jax.numpy as jnp
from jax import lax
from jax.experimental import pallas as pl
from jax.experimental.pallas import tpu as pltpu


def normalizing_flow_kernel(x_ref, vecA_ref, vecB_ref, scal_ref, out_ref,
                            *, maps, input_dim, batch, tile_b):
    """One batch tile of the whole flow chain.

    x_ref    : (tile_b, D) VMEM f32   batch tile (last tile may be ragged)
    vecA_ref : (L, D)      VMEM f32   planar: projection w | radial: reference
    vecB_ref : (L, D)      VMEM f32   planar: direction u  | radial: unused
    scal_ref : (L, 3)      SMEM f32   planar: (bias, w.u, 0)
                                      radial: (alpha, beta, ||reference||^2)
    out_ref  : (1, 1, 1)   VMEM f32   per-tile partial:
               sum_rows [ sum_flows logdet_row - 0.5 * ||x_final_row||^2 ]
    """
    x = x_ref[...]                                        # (tile_b, D) f32

    any_radial = any(k == 'radial' for k in maps)
    # Multiplicative determinant-factor accumulation -> only 2 logs at the end.
    prod_a = jnp.ones((tile_b, 1), jnp.float32)
    prod_b = jnp.ones((tile_b, 1), jnp.float32) if any_radial else None

    for i, kind in enumerate(maps):                       # static unroll over flows
        vA = vecA_ref[pl.ds(i, 1), :]                     # (1, D)
        s0 = scal_ref[i, 0]
        s1 = scal_ref[i, 1]

        if kind == 'planar':
            direc = vecB_ref[pl.ds(i, 1), :]              # (1, D)
            bias, coef = s0, s1                           # coef = w.u (hoisted)
            wxb = jnp.sum(x * vA, axis=-1, keepdims=True) + bias   # (tile_b, 1)
            hx = jnp.tanh(wxb)
            Dhx = 1.0 - hx * hx                           # sech^2 = 1 - tanh^2
            x = x + direc * hx
            prod_a = prod_a * jnp.abs(1.0 + Dhx * coef)
        else:  # radial
            alpha, beta = s0, s1
            wnorm = scal_ref[i, 2]                        # ||reference||^2 (hoisted)
            # r^2 = ||x - ref||^2 = sum(x*(x - 2*ref)) + ||ref||^2
            # (one lane reduction, no full-tile diff temporaries).
            r2 = jnp.sum(x * (x - 2.0 * vA), axis=-1, keepdims=True) + wnorm
            r = jnp.sqrt(jnp.maximum(r2, 0.0))            # (tile_b, 1)
            inv = pl.reciprocal(alpha + r)                # one divide, reused
            h = beta * inv
            x = (1.0 + h) * x - h * vA
            # 1 + h + Dh*r == 1 + h*alpha/(alpha+r)
            prod_a = prod_a * (1.0 + h * (alpha * inv))
            prod_b = prod_b * jnp.abs(1.0 + h)

    logdet_acc = jnp.log(prod_a)                          # (tile_b, 1)
    if any_radial:
        logdet_acc = logdet_acc + (input_dim - 1) * jnp.log(prod_b)

    # -0.5 * ||x_final||^2 per row.
    xsq = jnp.sum(x * x, axis=-1, keepdims=True)          # (tile_b, 1)
    row_contrib = logdet_acc - 0.5 * xsq

    # Mask rows beyond the true batch size (ragged last tile: unspecified data
    # is blocked by the select and never reaches the reduction).
    row0 = pl.program_id(0) * tile_b
    row_ids = row0 + lax.broadcasted_iota(jnp.int32, (tile_b, 1), 0)
    row_contrib = jnp.where(row_ids < batch, row_contrib, 0.0)

    tile_sum = jnp.sum(row_contrib, axis=0, keepdims=True)    # (1, 1)
    out_ref[...] = tile_sum.reshape(1, 1, 1)


def _choose_tile_b(batch, requested):
    """>= ~8 grid steps (megacore + pipelining) but <= 8192 rows (VMEM cap)."""
    tb = min(int(requested), 8192, max(8, -(-batch // 8)))
    return max(8, ((tb + 7) // 8) * 8)


def normalizing_flow(x, vecA, vecB, scal, maps, *, tile_b=8192):
    """Loss = -logp of the full flow chain (matches NormalizingFlow.forward)."""
    B, D = x.shape
    L = len(maps)
    assert L >= 1 and all(m in ('planar', 'radial') for m in maps)
    assert vecA.shape == (L, D) and vecB.shape == (L, D) and scal.shape == (L, 2)

    # No padded / materialized copies of x: the cast is a no-op for f32 inputs.
    x = jnp.asarray(x, jnp.float32)
    vecA = jnp.asarray(vecA, jnp.float32)
    vecB = jnp.asarray(vecB, jnp.float32)
    scal = jnp.asarray(scal, jnp.float32)

    tile_b = _choose_tile_b(B, tile_b)
    num_tiles = pl.cdiv(B, tile_b)

    # Hoist batch-independent scalars into a 3-column SMEM table:
    #   planar: (bias, w.u, 0)      radial: (alpha, beta, ||reference||^2)
    is_planar = jnp.asarray(np.array([m == 'planar' for m in maps]))
    coef = jnp.sum(vecA * vecB, axis=-1)
    wnorm = jnp.sum(vecA * vecA, axis=-1)
    scal_k = jnp.stack(
        [scal[:, 0],
         jnp.where(is_planar, coef, scal[:, 1]),
         jnp.where(is_planar, 0.0, wnorm)], axis=-1)

    kernel = functools.partial(normalizing_flow_kernel, maps=tuple(maps),
                               input_dim=D, batch=B, tile_b=tile_b)

    partials = pl.pallas_call(
        kernel,
        out_shape=jax.ShapeDtypeStruct((num_tiles, 1, 1), jnp.float32),
        grid=(num_tiles,),
        in_specs=[
            # x: pipelined batch tiles; last block dim == full feature dim (no pad).
            pl.BlockSpec((tile_b, D), lambda i: (i, 0)),
            pl.BlockSpec(memory_space=pltpu.MemorySpace.VMEM),     # vecA (whole, small)
            pl.BlockSpec(memory_space=pltpu.MemorySpace.VMEM),     # vecB (whole, small)
            pl.BlockSpec(memory_space=pltpu.MemorySpace.SMEM),     # scalar table
        ],
        out_specs=pl.BlockSpec((1, 1, 1), lambda i: (i, 0, 0)),    # per-tile partial
        compiler_params=pltpu.CompilerParams(
            dimension_semantics=("parallel",),
            vmem_limit_bytes=32 * 1024 * 1024),
    )(x, vecA, vecB, scal_k)

    # Wrapper epilogue: mean over the true batch, constant term, negation.
    logp = jnp.sum(partials) / B - (D / 2.0) * np.log(2.0 * np.pi)
    return -logp


def init_params(maps, input_dim, key):
    """Deterministic parameter init mirroring the module's __init__ + modify()."""
    L = len(maps)
    vecA = np.zeros((L, input_dim), np.float32)
    vecB = np.zeros((L, input_dim), np.float32)
    scal = np.zeros((L, 2), np.float32)
    std = float(np.sqrt(2.0 / (1 + input_dim)))        # xavier-normal std for (1, D)
    keys = jax.random.split(key, 4 * L)

    for i, kind in enumerate(maps):
        k0, k1, k2, _ = keys[4 * i: 4 * i + 4]
        if kind == 'planar':
            direction = std * jax.random.normal(k0, (input_dim,), jnp.float32)
            projection = std * jax.random.normal(k1, (input_dim,), jnp.float32)
            # modify(): ensure w.u > -1 (invertibility)
            coef = jnp.sum(projection * direction)
            m_coef = -1.0 + jnp.log1p(jnp.exp(coef))
            unit_proj = projection / jnp.sqrt(jnp.sum(projection ** 2))
            direction = jnp.where(coef <= -1.0,
                                  direction + (m_coef - coef) * unit_proj,
                                  direction)
            vecA[i] = np.asarray(projection, np.float32)
            vecB[i] = np.asarray(direction, np.float32)
            scal[i, 0] = 0.0                           # bias initialized to zero
        elif kind == 'radial':
            reference = std * jax.random.normal(k0, (input_dim,), jnp.float32)
            alpha = jnp.abs(jax.random.normal(k1, (), jnp.float32))
            beta = jax.random.normal(k2, (), jnp.float32)
            # modify(): alpha >= 0, beta > -alpha
            alpha = jnp.maximum(0.0, alpha)
            beta = jnp.where(beta <= -alpha,
                             -alpha + jnp.log1p(jnp.exp(beta)), beta)
            vecA[i] = np.asarray(reference, np.float32)
            scal[i, 0] = float(alpha)
            scal[i, 1] = float(beta)
        else:
            raise ValueError('Invalid flow type!')

    return jnp.asarray(vecA), jnp.asarray(vecB), jnp.asarray(scal)


def reference_forward(x, vecA, vecB, scal, maps):
    """Pure-JAX reference of NormalizingFlow.forward (original formulation)."""
    D = x.shape[1]
    logp = 0.0
    for i, kind in enumerate(maps):
        if kind == 'planar':
            proj = vecA[i:i + 1]
            direc = vecB[i:i + 1]
            bias = scal[i, 0]
            wxb = jnp.sum(x * proj, axis=-1, keepdims=True) + bias
            hx = jnp.tanh(wxb)
            Dhx = 1.0 / jnp.cosh(wxb) ** 2
            coef = jnp.sum(proj * direc, axis=-1, keepdims=True)
            x = x + direc * hx
            logdet = jnp.log(jnp.abs(1.0 + Dhx * coef))
        else:
            ref = vecA[i:i + 1]
            alpha, beta = scal[i, 0], scal[i, 1]
            diff = x - ref
            r = jnp.sqrt(jnp.sum(diff ** 2, axis=-1, keepdims=True))
            h = beta / (alpha + r)
            Dh = -beta / (alpha + r) ** 2
            x = x + h * diff
            logdet = (D - 1) * jnp.log(jnp.abs(1.0 + h)) + jnp.log(1.0 + h + Dh * r)
        logp = logp + jnp.mean(logdet)
    logp = logp - (D / 2.0) * np.log(2.0 * np.pi)
    logp = logp - jnp.mean(jnp.sum(x ** 2, axis=1)) / 2.0
    return -logp


# TODO(synk): PlanarFlow.inverse / RadialFlow.inverse use host-side bisection
# root-finding and are not part of forward(); not implemented as a kernel.

if __name__ == "__main__":
    maps = ('planar', 'radial', 'planar', 'radial')
    B, D = 300, 16          # deliberately not multiples of the tile / lane sizes

    key = jax.random.PRNGKey(0)
    kx, kp = jax.random.split(key)
    x = jax.random.normal(kx, (B, D), dtype=jnp.float32)
    vecA, vecB, scal = init_params(maps, D, kp)

    # Adaptive tiling -> tile_b=40, 8 grid steps; last tile is ragged (20 valid
    # rows), exercising the parallel grid + in-kernel row masking.
    loss = normalizing_flow(x, vecA, vecB, scal, maps)
    loss = jax.block_until_ready(loss)

    ref = jax.block_until_ready(reference_forward(x, vecA, vecB, scal, maps))
    np.testing.assert_allclose(np.asarray(loss), np.asarray(ref),
                               rtol=1e-4, atol=1e-4)

    print("KERNEL_OK")
</pallas_src>

<mosaic_0001>
module attributes {stable_mosaic.version = 11 : i64} {
  func.func @normalizing_flow_kernel(%arg0: i32, %arg1: memref<40x16xf32, #tpu.memory_space<vmem>>, %arg2: memref<4x16xf32, #tpu.memory_space<vmem>>, %arg3: memref<4x16xf32, #tpu.memory_space<vmem>>, %arg4: memref<4x3xf32, #tpu.memory_space<smem>>, %arg5: memref<1x1x1xf32, #tpu.memory_space<vmem>>) attributes {dimension_semantics = [#tpu.dimension_semantics<parallel>], iteration_bounds = array<i64: 8>, scalar_prefetch = 0 : i64, scratch_operands = 0 : i64, tpu.core_type = #tpu.core_type<tc>, window_params = [{transform_indices = @transform_0, window_bounds = array<i64: 40, 16>}, {pipeline_mode = #tpu.pipeline_mode<synchronous>, transform_indices = @transform_1, window_bounds = array<i64: 4, 16>}, {pipeline_mode = #tpu.pipeline_mode<synchronous>, transform_indices = @transform_2, window_bounds = array<i64: 4, 16>}, {transform_indices = @transform_3, window_bounds = array<i64: 4, 3>}, {transform_indices = @transform_4, window_bounds = array<i64: 1, 1, 1>}]} {
    %c0 = arith.constant 0 : index
    %c0_0 = arith.constant 0 : index
    %0 = vector.load %arg1[%c0, %c0_0] : memref<40x16xf32, #tpu.memory_space<vmem>>, vector<40x16xf32>
    %cst = arith.constant 1.000000e+00 : f32
    %1 = vector.broadcast %cst : f32 to vector<40x1xf32>
    %cst_1 = arith.constant 1.000000e+00 : f32
    %2 = vector.broadcast %cst_1 : f32 to vector<40x1xf32>
    %c0_2 = arith.constant 0 : index
    %c0_3 = arith.constant 0 : index
    %3 = vector.load %arg2[%c0_2, %c0_3] : memref<4x16xf32, #tpu.memory_space<vmem>>, vector<1x16xf32>
    %c0_4 = arith.constant 0 : index
    %c0_5 = arith.constant 0 : index
    %4 = memref.load %arg4[%c0_4, %c0_5] : memref<4x3xf32, #tpu.memory_space<smem>>
    %c0_6 = arith.constant 0 : index
    %c1 = arith.constant 1 : index
    %5 = memref.load %arg4[%c0_6, %c1] : memref<4x3xf32, #tpu.memory_space<smem>>
    %c0_7 = arith.constant 0 : index
    %c0_8 = arith.constant 0 : index
    %6 = vector.load %arg3[%c0_7, %c0_8] : memref<4x16xf32, #tpu.memory_space<vmem>>, vector<1x16xf32>
    %7 = vector.broadcast %3 : vector<1x16xf32> to vector<40x16xf32>
    %8 = arith.mulf %0, %7 : vector<40x16xf32>
    %cst_9 = arith.constant dense<0.000000e+00> : vector<40xf32>
    %9 = vector.multi_reduction <add>, %8, %cst_9 [1] : vector<40x16xf32> to vector<40xf32>
    %10 = vector.shape_cast %9 : vector<40xf32> to vector<40x1xf32>
    %11 = vector.broadcast %4 : f32 to vector<40x1xf32>
    %12 = arith.addf %10, %11 : vector<40x1xf32>
    %13 = math.tanh %12 : vector<40x1xf32>
    %14 = arith.mulf %13, %13 : vector<40x1xf32>
    %cst_10 = arith.constant 1.000000e+00 : f32
    %15 = vector.broadcast %cst_10 : f32 to vector<40x1xf32>
    %16 = arith.subf %15, %14 : vector<40x1xf32>
    %17 = vector.broadcast %6 : vector<1x16xf32> to vector<40x16xf32>
    %18 = vector.broadcast %13 : vector<40x1xf32> to vector<40x16xf32>
    %19 = arith.mulf %17, %18 : vector<40x16xf32>
    %20 = arith.addf %0, %19 : vector<40x16xf32>
    %21 = vector.broadcast %5 : f32 to vector<40x1xf32>
    %22 = arith.mulf %16, %21 : vector<40x1xf32>
    %cst_11 = arith.constant 1.000000e+00 : f32
    %23 = vector.broadcast %cst_11 : f32 to vector<40x1xf32>
    %24 = arith.addf %23, %22 : vector<40x1xf32>
    %25 = math.absf %24 : vector<40x1xf32>
    %26 = arith.mulf %1, %25 : vector<40x1xf32>
    %c1_12 = arith.constant 1 : index
    %c0_13 = arith.constant 0 : index
    %27 = vector.load %arg2[%c1_12, %c0_13] : memref<4x16xf32, #tpu.memory_space<vmem>>, vector<1x16xf32>
    %c1_14 = arith.constant 1 : index
    %c0_15 = arith.constant 0 : index
    %28 = memref.load %arg4[%c1_14, %c0_15] : memref<4x3xf32, #tpu.memory_space<smem>>
    %c1_16 = arith.constant 1 : index
    %c1_17 = arith.constant 1 : index
    %29 = memref.load %arg4[%c1_16, %c1_17] : memref<4x3xf32, #tpu.memory_space<smem>>
    %c1_18 = arith.constant 1 : index
    %c2 = arith.constant 2 : index
    %30 = memref.load %arg4[%c1_18, %c2] : memref<4x3xf32, #tpu.memory_space<smem>>
    %cst_19 = arith.constant 2.000000e+00 : f32
    %31 = vector.broadcast %cst_19 : f32 to vector<1x16xf32>
    %32 = arith.mulf %31, %27 : vector<1x16xf32>
    %33 = vector.broadcast %32 : vector<1x16xf32> to vector<40x16xf32>
    %34 = arith.subf %20, %33 : vector<40x16xf32>
    %35 = arith.mulf %20, %34 : vector<40x16xf32>
    %cst_20 = arith.constant dense<0.000000e+00> : vector<40xf32>
    %36 = vector.multi_reduction <add>, %35, %cst_20 [1] : vector<40x16xf32> to vector<40xf32>
    %37 = vector.shape_cast %36 : vector<40xf32> to vector<40x1xf32>
    %38 = vector.broadcast %30 : f32 to vector<40x1xf32>
    %39 = arith.addf %37, %38 : vector<40x1xf32>
    %cst_21 = arith.constant 0.000000e+00 : f32
    %40 = vector.broadcast %cst_21 : f32 to vector<40x1xf32>
    %41 = arith.maximumf %39, %40 : vector<40x1xf32>
    %42 = math.sqrt %41 : vector<40x1xf32>
    %43 = vector.broadcast %28 : f32 to vector<40x1xf32>
    %44 = arith.addf %43, %42 : vector<40x1xf32>
    %45 = tpu.reciprocal %44 : vector<40x1xf32> -> vector<40x1xf32>
    %46 = vector.broadcast %29 : f32 to vector<40x1xf32>
    %47 = arith.mulf %46, %45 : vector<40x1xf32>
    %cst_22 = arith.constant 1.000000e+00 : f32
    %48 = vector.broadcast %cst_22 : f32 to vector<40x1xf32>
    %49 = arith.addf %48, %47 : vector<40x1xf32>
    %50 = vector.broadcast %49 : vector<40x1xf32> to vector<40x16xf32>
    %51 = arith.mulf %50, %20 : vector<40x16xf32>
    %52 = vector.broadcast %47 : vector<40x1xf32> to vector<40x16xf32>
    %53 = vector.broadcast %27 : vector<1x16xf32> to vector<40x16xf32>
    %54 = arith.mulf %52, %53 : vector<40x16xf32>
    %55 = arith.subf %51, %54 : vector<40x16xf32>
    %56 = vector.broadcast %28 : f32 to vector<40x1xf32>
    %57 = arith.mulf %56, %45 : vector<40x1xf32>
    %58 = arith.mulf %47, %57 : vector<40x1xf32>
    %cst_23 = arith.constant 1.000000e+00 : f32
    %59 = vector.broadcast %cst_23 : f32 to vector<40x1xf32>
    %60 = arith.addf %59, %58 : vector<40x1xf32>
    %61 = arith.mulf %26, %60 : vector<40x1xf32>
    %cst_24 = arith.constant 1.000000e+00 : f32
    %62 = vector.broadcast %cst_24 : f32 to vector<40x1xf32>
    %63 = arith.addf %62, %47 : vector<40x1xf32>
    %64 = math.absf %63 : vector<40x1xf32>
    %65 = arith.mulf %2, %64 : vector<40x1xf32>
    %c2_25 = arith.constant 2 : index
    %c0_26 = arith.constant 0 : index
    %66 = vector.load %arg2[%c2_25, %c0_26] : memref<4x16xf32, #tpu.memory_space<vmem>>, vector<1x16xf32>
    %c2_27 = arith.constant 2 : index
    %c0_28 = arith.constant 0 : index
    %67 = memref.load %arg4[%c2_27, %c0_28] : memref<4x3xf32, #tpu.memory_space<smem>>
    %c2_29 = arith.constant 2 : index
    %c1_30 = arith.constant 1 : index
    %68 = memref.load %arg4[%c2_29, %c1_30] : memref<4x3xf32, #tpu.memory_space<smem>>
    %c2_31 = arith.constant 2 : index
    %c0_32 = arith.constant 0 : index
    %69 = vector.load %arg3[%c2_31, %c0_32] : memref<4x16xf32, #tpu.memory_space<vmem>>, vector<1x16xf32>
    %70 = vector.broadcast %66 : vector<1x16xf32> to vector<40x16xf32>
    %71 = arith.mulf %55, %70 : vector<40x16xf32>
    %cst_33 = arith.constant dense<0.000000e+00> : vector<40xf32>
    %72 = vector.multi_reduction <add>, %71, %cst_33 [1] : vector<40x16xf32> to vector<40xf32>
    %73 = vector.shape_cast %72 : vector<40xf32> to vector<40x1xf32>
    %74 = vector.broadcast %67 : f32 to vector<40x1xf32>
    %75 = arith.addf %73, %74 : vector<40x1xf32>
    %76 = math.tanh %75 : vector<40x1xf32>
    %77 = arith.mulf %76, %76 : vector<40x1xf32>
    %cst_34 = arith.constant 1.000000e+00 : f32
    %78 = vector.broadcast %cst_34 : f32 to vector<40x1xf32>
    %79 = arith.subf %78, %77 : vector<40x1xf32>
    %80 = vector.broadcast %69 : vector<1x16xf32> to vector<40x16xf32>
    %81 = vector.broadcast %76 : vector<40x1xf32> to vector<40x16xf32>
    %82 = arith.mulf %80, %81 : vector<40x16xf32>
    %83 = arith.addf %55, %82 : vector<40x16xf32>
    %84 = vector.broadcast %68 : f32 to vector<40x1xf32>
    %85 = arith.mulf %79, %84 : vector<40x1xf32>
    %cst_35 = arith.constant 1.000000e+00 : f32
    %86 = vector.broadcast %cst_35 : f32 to vector<40x1xf32>
    %87 = arith.addf %86, %85 : vector<40x1xf32>
    %88 = math.absf %87 : vector<40x1xf32>
    %89 = arith.mulf %61, %88 : vector<40x1xf32>
    %c3 = arith.constant 3 : index
    %c0_36 = arith.constant 0 : index
    %90 = vector.load %arg2[%c3, %c0_36] : memref<4x16xf32, #tpu.memory_space<vmem>>, vector<1x16xf32>
    %c3_37 = arith.constant 3 : index
    %c0_38 = arith.constant 0 : index
    %91 = memref.load %arg4[%c3_37, %c0_38] : memref<4x3xf32, #tpu.memory_space<smem>>
    %c3_39 = arith.constant 3 : index
    %c1_40 = arith.constant 1 : index
    %92 = memref.load %arg4[%c3_39, %c1_40] : memref<4x3xf32, #tpu.memory_space<smem>>
    %c3_41 = arith.constant 3 : index
    %c2_42 = arith.constant 2 : index
    %93 = memref.load %arg4[%c3_41, %c2_42] : memref<4x3xf32, #tpu.memory_space<smem>>
    %cst_43 = arith.constant 2.000000e+00 : f32
    %94 = vector.broadcast %cst_43 : f32 to vector<1x16xf32>
    %95 = arith.mulf %94, %90 : vector<1x16xf32>
    %96 = vector.broadcast %95 : vector<1x16xf32> to vector<40x16xf32>
    %97 = arith.subf %83, %96 : vector<40x16xf32>
    %98 = arith.mulf %83, %97 : vector<40x16xf32>
    %cst_44 = arith.constant dense<0.000000e+00> : vector<40xf32>
    %99 = vector.multi_reduction <add>, %98, %cst_44 [1] : vector<40x16xf32> to vector<40xf32>
    %100 = vector.shape_cast %99 : vector<40xf32> to vector<40x1xf32>
    %101 = vector.broadcast %93 : f32 to vector<40x1xf32>
    %102 = arith.addf %100, %101 : vector<40x1xf32>
    %cst_45 = arith.constant 0.000000e+00 : f32
    %103 = vector.broadcast %cst_45 : f32 to vector<40x1xf32>
    %104 = arith.maximumf %102, %103 : vector<40x1xf32>
    %105 = math.sqrt %104 : vector<40x1xf32>
    %106 = vector.broadcast %91 : f32 to vector<40x1xf32>
    %107 = arith.addf %106, %105 : vector<40x1xf32>
    %108 = tpu.reciprocal %107 : vector<40x1xf32> -> vector<40x1xf32>
    %109 = vector.broadcast %92 : f32 to vector<40x1xf32>
    %110 = arith.mulf %109, %108 : vector<40x1xf32>
    %cst_46 = arith.constant 1.000000e+00 : f32
    %111 = vector.broadcast %cst_46 : f32 to vector<40x1xf32>
    %112 = arith.addf %111, %110 : vector<40x1xf32>
    %113 = vector.broadcast %112 : vector<40x1xf32> to vector<40x16xf32>
    %114 = arith.mulf %113, %83 : vector<40x16xf32>
    %115 = vector.broadcast %110 : vector<40x1xf32> to vector<40x16xf32>
    %116 = vector.broadcast %90 : vector<1x16xf32> to vector<40x16xf32>
    %117 = arith.mulf %115, %116 : vector<40x16xf32>
    %118 = arith.subf %114, %117 : vector<40x16xf32>
    %119 = vector.broadcast %91 : f32 to vector<40x1xf32>
    %120 = arith.mulf %119, %108 : vector<40x1xf32>
    %121 = arith.mulf %110, %120 : vector<40x1xf32>
    %cst_47 = arith.constant 1.000000e+00 : f32
    %122 = vector.broadcast %cst_47 : f32 to vector<40x1xf32>
    %123 = arith.addf %122, %121 : vector<40x1xf32>
    %124 = arith.mulf %89, %123 : vector<40x1xf32>
    %cst_48 = arith.constant 1.000000e+00 : f32
    %125 = vector.broadcast %cst_48 : f32 to vector<40x1xf32>
    %126 = arith.addf %125, %110 : vector<40x1xf32>
    %127 = math.absf %126 : vector<40x1xf32>
    %128 = arith.mulf %65, %127 : vector<40x1xf32>
    %129 = math.log %124 : vector<40x1xf32>
    %130 = math.log %128 : vector<40x1xf32>
    %cst_49 = arith.constant 1.500000e+01 : f32
    %131 = vector.broadcast %cst_49 : f32 to vector<40x1xf32>
    %132 = arith.mulf %131, %130 : vector<40x1xf32>
    %133 = arith.addf %129, %132 : vector<40x1xf32>
    %134 = arith.mulf %118, %118 : vector<40x16xf32>
    %cst_50 = arith.constant dense<0.000000e+00> : vector<40xf32>
    %135 = vector.multi_reduction <add>, %134, %cst_50 [1] : vector<40x16xf32> to vector<40xf32>
    %136 = vector.shape_cast %135 : vector<40xf32> to vector<40x1xf32>
    %cst_51 = arith.constant 5.000000e-01 : f32
    %137 = vector.broadcast %cst_51 : f32 to vector<40x1xf32>
    %138 = arith.mulf %137, %136 : vector<40x1xf32>
    %139 = arith.subf %133, %138 : vector<40x1xf32>
    %c40_i32 = arith.constant 40 : i32
    %140 = arith.muli %arg0, %c40_i32 : i32
    %141 = tpu.iota {dimensions = array<i32: 0>} : vector<40x1xi32>
    %142 = vector.broadcast %140 : i32 to vector<40x1xi32>
    %143 = arith.addi %142, %141 : vector<40x1xi32>
    %c300_i32 = arith.constant 300 : i32
    %144 = vector.broadcast %c300_i32 : i32 to vector<40x1xi32>
    %145 = arith.cmpi slt, %143, %144 : vector<40x1xi32>
    %cst_52 = arith.constant 0.000000e+00 : f32
    %146 = vector.broadcast %cst_52 : f32 to vector<40x1xf32>
    %147 = arith.select %145, %139, %146 : vector<40x1xi1>, vector<40x1xf32>
    %cst_53 = arith.constant dense<0.000000e+00> : vector<1xf32>
    %148 = vector.multi_reduction <add>, %147, %cst_53 [0] : vector<40x1xf32> to vector<1xf32>
    %149 = vector.shape_cast %148 : vector<1xf32> to vector<1x1xf32>
    %150 = vector.shape_cast %149 : vector<1x1xf32> to vector<1x1x1xf32>
    %c0_54 = arith.constant 0 : index
    %c0_55 = arith.constant 0 : index
    %c0_56 = arith.constant 0 : index
    %151 = vector.load %arg5[%c0_54, %c0_55, %c0_56] : memref<1x1x1xf32, #tpu.memory_space<vmem>>, vector<1x1x1xf32>
    tpu.vector_store %arg5[%c0_54, %c0_55, %c0_56], %150 {strides = array<i32>} : memref<1x1x1xf32, #tpu.memory_space<vmem>>, vector<1x1x1xf32>,
    return
  }
  func.func @transform_0(%arg0: i32) -> (i32, i32) {
    %c0_i32 = arith.constant 0 : i32
    %c0_i32_0 = arith.constant 0 : i32
    return %arg0, %c0_i32 : i32, i32
  }
  func.func @transform_1(%arg0: i32) -> (i32, i32) {
    %c0_i32 = arith.constant 0 : i32
    %c0_i32_0 = arith.constant 0 : i32
    %c0_i32_1 = arith.constant 0 : i32
    return %c0_i32, %c0_i32_0 : i32, i32
  }
  func.func @transform_2(%arg0: i32) -> (i32, i32) {
    %c0_i32 = arith.constant 0 : i32
    %c0_i32_0 = arith.constant 0 : i32
    %c0_i32_1 = arith.constant 0 : i32
    return %c0_i32, %c0_i32_0 : i32, i32
  }
  func.func @transform_3(%arg0: i32) -> (i32, i32) {
    %c0_i32 = arith.constant 0 : i32
    %c0_i32_0 = arith.constant 0 : i32
    %c0_i32_1 = arith.constant 0 : i32
    return %c0_i32, %c0_i32_0 : i32, i32
  }
  func.func @transform_4(%arg0: i32) -> (i32, i32, i32) {
    %c0_i32 = arith.constant 0 : i32
    %c0_i32_0 = arith.constant 0 : i32
    %c0_i32_1 = arith.constant 0 : i32
    return %arg0, %c0_i32, %c0_i32_0 : i32, i32, i32
  }
}

</mosaic_0001>

<bundles_post_ra>
// kernel: tpu_custom_call.1
= control target key start
LH: loop header
LB: loop body
LE: loop exit
PB: predicated region body
PF: predicated region fallthrough
CT: control target
= control target key end

     0   :  { %9 = vsyncpa [#allocation3], 0  ;;  %s1025_s15 = smov 0   ;;  %s1312_s0 = inlined_call_operand.vmem [shape: f32[300,16], index: 0, kind: input, shape index: {}]   ;;  %s1313_s1 = inlined_call_operand.vmem [shape: f32[4,16], index: 1, kind: input, shape index: {}]   ;;  %s1314_s2 = inlined_call_operand.vmem [shape: f32[4,16], index: 2, kind: input, shape index: {}]   ;;  %s1315_s3 = inlined_call_operand.vmem [shape: f32[4,3], index: 3, kind: input, shape index: {}]   ;;  %s1316_s4 = inlined_call_operand.vmem [shape: f32[8,1,1], index: 4, kind: output, shape index: {}]  }
   0x1 LB: > { %s1031_s16 = sadd.s32 4294967295, %s997_s15   ;;  %p852_p0 = scmp.ge.s32.totalorder %s997_s15, 1  ;;  %s997_s15 = sphi %s1025_s15, %s15_s15  }
   0x2   : > { %p135_p1 = scmp.lt.s32.totalorder %s997_s15, 9  ;;  %s154_s19 = sshll.u32 %s1315_s3, 4  ;;  %s155_s19 = int_to_ptr.vmem [resolvable:$true] %s154_s19 }
   0x3   : > { %p881_p3 = scmp.eq.s32.totalorder %s1031_s16, 0  ;;  %s972_s21 = scalar_lea.vmem %s155_s19, 64 }
   0x4   : > { %p1038_p2 = pnand %p852_p0, %p135_p1  ;;  %p973_p6 = scmp.ne.s32.totalorder %s155_s19, %s972_s21 }
   0x5   : > { %p980_p10 = scmp.lt.s32.totalorder %s155_s19, %s155_s19  ;;  %p981_p11 = scmp.lt.s32.totalorder %s972_s21, %s972_s21 }
   0x6   : > { %p877_p4 = pneg %p1038_p2 }
   0x7   : > { %p982_p12 = por %p981_p11, %p980_p10 }
   0x8   : > { %p878_p5 = pnand %p881_p3, %p877_p4 }
   0xa   : > { %p974_p7 = pneg %p878_p5 }
   0xc   : > { %p975_p8 = pnand %p974_p7, %p973_p6 }
   0xe   : > { %p976_p9 = pneg %p975_p8 }
  0x10   : > { %p983_p13 = pnand %p982_p12, %p976_p9 }
  0x12   : > { %986 = shalt.err (!%p983_p13)
}
  0x13   : > { %s999_s22 = smov [#allocation2]   ;;  %184 = sbr.rel (%p1038_p2) target bundleno = 913 (0x391), region = 36 }
  0x14   : > { %880 = dma.vmem_to_smem (!%p878_p5), %s155_s19, 64, %s999_s22, [#allocation3]  }
  0x1a   : > { %992 = dma.done.wait (%p881_p3), [#allocation3], 64  }
  0x1b   : > { %994 = vsyncadd (%p881_p3), [#allocation3], 4294967232 }
  0x1c   : > { %190 = sfence }
  0x1d   : > { %s213_s23 = smul.u32 5, %s1031_s16  ;;  %v859_v0 = vld [vmem:[%s1313_s1] ss:$0 sm:$0xff]  ;;  %vm248_vm0 = vcmask 130048   ;;  %s236_s30 = sld [smem:[#allocation2]]  ;;  %v320_v21 = vlaneseq }
  0x1e   : > { %v1070_v27 = vld [vmem:[%s1313_s1 + $0x1] sm:$0x1]  ;;  %v860_v32 = vld [vmem:[%s1314_s2] ss:$0 sm:$0xff]  ;;  %s863_s9 = sld [smem:[#allocation2 + $0x82]]  ;;  %s861_s10 = sld [smem:[#allocation2 + $0x80]] }
  0x1f   : > { %p218_p0 = scmp.lt.s32.totalorder %s213_s23, 37  ;;  %v1065_v26 = vshrl.u32 %v320_v21, 7  ;;  %v319_v30 = vmul.f32 2.0, %v1070_v27  ;;  %s858_s11 = sld [smem:[#allocation2 + $0x1]] }
  0x20   : > { %s1126_s12 = sld [smem:[#allocation2 + $0x81]]  ;;  %s864_s17 = sld [smem:[#allocation2 + $0x100]] }
  0x21   : > { %s1319_s23 = smov (!%p218_p0, %s213_s23), 37  ;;  %v1074_v31 = vsub.s32 0, %v1065_v26  ;;  %s865_s18 = sld [smem:[#allocation2 + $0x101]] }
  0x22   : > { %s857_s24 = sshll.u32 %s1319_s23, 3  ;;  %s870_s23 = sld [smem:[#allocation2 + $0x182]] }
  0x23   : > { %s221_s29 = scalar_lea.vmem %s1312_s0, %s857_s24  ;;  %v264_v16 = vstv %s236_s30  ;;  %v323_v36 = vrot.slane %v319_v30, %v1074_v31  ;;  %s868_s24 = sld [smem:[#allocation2 + $0x180]] }
  0x24   : > { %v230_v1 = vld [vmem:[%s221_s29] sm:$0xff]  ;;  %v232_v2 = vld [vmem:[%s221_s29 + $0x10] sm:$0xff]  ;;  %v231_v3 = vld [vmem:[%s221_s29 + $0x8] sm:$0xff]  ;;  %s869_s25 = sld [smem:[#allocation2 + $0x181]]  ;;  %s756_s26 = smul.u32 40, %s1031_s16 }
  0x25   : > { %v243_v4 = vmul.f32 %v859_v0, %v230_v1  ;;  %v245_v5 = vmul.f32 %v859_v0, %v232_v2  ;;  %v244_v6 = vmul.f32 %v859_v0, %v231_v3  ;;  %v233_v7 = vld [vmem:[%s221_s29 + $0x18] sm:$0xff]  ;;  %v234_v9 = vld [vmem:[%s221_s29 + $0x20] sm:$0xff]  ;;  %p227_p1 = scmp.lt.s32.totalorder %s1031_s16, 7 }
  0x26   : > { %v246_v8 = vmul.f32 %v859_v0, %v233_v7  ;;  %v247_v14 = vmul.f32 %v859_v0, %v234_v9  ;;  %v349_v0 = vstv %s863_s9 }
  0x27   : > { %v249_v10 = vsel %vm248_vm0, %v243_v4, 0.0  ;;  %v255_v11 = vsel %vm248_vm0, %v245_v5, 0.0  ;;  %v252_v12 = vsel %vm248_vm0, %v244_v6, 0.0  ;;  %s1321_s16 = smov (!%p227_p1, %s1031_s16), 7 }
  0x28   : > { %250 = vadd.xlane.f32.xlu0 %v249_v10  ;;  %256 = vadd.xlane.f32.xlu1 %v255_v11  ;;  %v258_v13 = vsel %vm248_vm0, %v246_v8, 0.0  ;;  %v261_v15 = vsel %vm248_vm0, %v247_v14, 0.0  ;;  %s229_s29 = scalar_lea.vmem %s1316_s4, %s1321_s16 }
  0x2c   : > { %253 = vadd.xlane.f32.xlu0 %v252_v12  ;;  %259 = vadd.xlane.f32.xlu1 %v258_v13 }
  0x30   : > { %262 = vadd.xlane.f32.xlu0 %v261_v15 }
  0xb5   : > { %v251_v17 = vpop.xlane.xlu0 %250  ;;  %v257_v18 = vpop.xlane.xlu1 %256 }
  0xb6   : > { %v265_v19 = vadd.f32 %v264_v16, %v251_v17  ;;  %v267_v20 = vadd.f32 %v264_v16, %v257_v18  ;;  %v1117_v17 = vstv %s861_s10 }
  0xb8   : > { %892 = vtanh.f32 %v265_v19 }
  0xb9   : > { %894 = vtanh.f32 %v267_v20  ;;  %v254_v22 = vpop.xlane.xlu0 %253  ;;  %v260_v23 = vpop.xlane.xlu1 %259 }
  0xba   : > { %v266_v24 = vadd.f32 %v264_v16, %v254_v22  ;;  %v268_v25 = vadd.f32 %v264_v16, %v260_v23 }
  0xbc   : > { %896 = vtanh.f32 %v266_v24  ;;  %v1119_v24 = vstv %s858_s11 }
  0xbd   : > { %898 = vtanh.f32 %v268_v25  ;;  %v263_v28 = vpop.xlane.xlu0 %262 }
  0xbe   : > { %v269_v29 = vadd.f32 %v264_v16, %v263_v28 }
  0xc0   : > { %900 = vtanh.f32 %v269_v29 }
  0xc2   : > { %v893_v33 = vpop.eup %892 }
  0xc3   : > { %v1079_v34 = vpop.eup %894  ;;  %v289_v35 = vmul.f32 %v893_v33, %v860_v32  ;;  %v275_v19 = vmul.f32 %v893_v33, %v893_v33 }
  0xc4   : > { %v291_v37 = vmul.f32 %v1079_v34, %v860_v32  ;;  %v277_v30 = vmul.f32 %v1079_v34, %v1079_v34 }
  0xc5   : > { %v1083_v38 = vadd.f32 %v289_v35, %v230_v1  ;;  %v280_v29 = vsub.f32 1.0, %v275_v19 }
  0xc6   : > { %v1085_v39 = vpop.eup %896  ;;  %v1087_v40 = vadd.f32 %v291_v37, %v232_v2 }
  0xc7   : > { %v1089_v41 = vpop.eup %898  ;;  %v324_v42 = vsub.f32 %v1083_v38, %v323_v36  ;;  %v290_v43 = vmul.f32 %v1085_v39, %v860_v32 }
  0xc8   : > { %v326_v44 = vsub.f32 %v1087_v40, %v323_v36  ;;  %v292_v45 = vmul.f32 %v1089_v41, %v860_v32 }
  0xc9   : > { %v329_v46 = vmul.f32 %v324_v42, %v1083_v38  ;;  %v1096_v47 = vadd.f32 %v290_v43, %v231_v3 }
  0xca   : > { %v1098_v48 = vpop.eup %900  ;;  %v1100_v49 = vadd.f32 %v292_v45, %v233_v7  ;;  %v331_v51 = vmul.f32 %v326_v44, %v1087_v40 }
  0xcb   : > { %v334_v50 = vsel %vm248_vm0, %v329_v46, 0.0  ;;  %v325_v52 = vsub.f32 %v1096_v47, %v323_v36  ;;  %v293_v54 = vmul.f32 %v1098_v48, %v860_v32  ;;  %v276_v32 = vmul.f32 %v1085_v39, %v1085_v39 }
  0xcc   : > { %335 = vadd.xlane.f32.xlu1 %v334_v50  ;;  %v327_v53 = vsub.f32 %v1100_v49, %v323_v36  ;;  %v340_v56 = vsel %vm248_vm0, %v331_v51, 0.0  ;;  %v300_v39 = vmul.f32 %v1119_v24, %v280_v29  ;;  %v282_v50 = vsub.f32 1.0, %v277_v30 }
  0xcd   : > { %v330_v55 = vmul.f32 %v325_v52, %v1096_v47  ;;  %v1109_v57 = vadd.f32 %v293_v54, %v234_v9  ;;  %v278_v51 = vmul.f32 %v1089_v41, %v1089_v41  ;;  %v281_v54 = vsub.f32 1.0, %v276_v32 }
  0xce   : > { %v332_v59 = vmul.f32 %v327_v53, %v1100_v49 }
  0xcf   : > { %v337_v58 = vsel %vm248_vm0, %v330_v55, 0.0  ;;  %v328_v60 = vsub.f32 %v1109_v57, %v323_v36  ;;  %v279_v55 = vmul.f32 %v1098_v48, %v1098_v48 }
  0xd0   : > { %341 = vadd.xlane.f32.xlu1 %v340_v56  ;;  %338 = vadd.xlane.f32.xlu0 %v337_v58  ;;  %v343_v62 = vsel %vm248_vm0, %v332_v59, 0.0 }
  0xd1   : > { %v333_v61 = vmul.f32 %v328_v60, %v1109_v57 }
  0xd3   : > { %v346_v63 = vsel %vm248_vm0, %v333_v61, 0.0 }
  0xd4   : > { %344 = vadd.xlane.f32.xlu0 %v343_v62  ;;  %347 = vadd.xlane.f32.xlu1 %v346_v63  ;;  %v406_v63 = vstv %s1126_s12 }
 0x159   : > { %v336_v1 = vpop.xlane.xlu1 %335 }
 0x15a   : > { %v350_v2 = vadd.f32 %v349_v0, %v336_v1 }
 0x15c   : > { %v355_v3 = vmax.f32 %v350_v2, 0.0 }
 0x15d   : > { %v342_v4 = vpop.xlane.xlu1 %341  ;;  %v339_v5 = vpop.xlane.xlu0 %338 }
 0x15e   : > { %902 = vrsqrt.f32 %v355_v3  ;;  %v352_v6 = vadd.f32 %v349_v0, %v342_v4  ;;  %v351_v7 = vadd.f32 %v349_v0, %v339_v5  ;;  %vm362_vm1 = vcmp.eq.f32.partialorder %v355_v3, inf }
 0x15f   : > { %v365_v20 = vand.u32 2147483648, %v355_v3  ;;  %vm364_vm2 = vcmp.eq.f32.partialorder %v355_v3, 0.0  ;;  %v301_v4 = vmul.f32 %v1119_v24, %v281_v54  ;;  %v283_v5 = vsub.f32 1.0, %v278_v51 }
 0x160   : > { %v357_v8 = vmax.f32 %v352_v6, 0.0  ;;  %v356_v9 = vmax.f32 %v351_v7, 0.0 }
 0x161   : > { %v345_v10 = vpop.xlane.xlu0 %344  ;;  %v348_v11 = vpop.xlane.xlu1 %347 }
 0x162   : > { %904 = vrsqrt.f32 %v357_v8  ;;  %v354_v12 = vadd.f32 %v349_v0, %v348_v11  ;;  %v353_v13 = vadd.f32 %v349_v0, %v345_v10  ;;  %vm376_vm3 = vcmp.eq.f32.partialorder %v357_v8, inf }
 0x163   : > { %906 = vrsqrt.f32 %v356_v9  ;;  %v379_v35 = vand.u32 2147483648, %v357_v8  ;;  %vm378_vm4 = vcmp.eq.f32.partialorder %v357_v8, 0.0  ;;  %vm369_vm5 = vcmp.eq.f32.partialorder %v356_v9, inf }
 0x164   : > { %v359_v14 = vmax.f32 %v354_v12, 0.0  ;;  %v358_v15 = vmax.f32 %v353_v13, 0.0  ;;  %v372_v42 = vand.u32 2147483648, %v356_v9  ;;  %vm371_vm6 = vcmp.eq.f32.partialorder %v356_v9, 0.0 }
 0x165   : > { %v302_v0 = vmul.f32 %v1119_v24, %v282_v50  ;;  %v284_v10 = vsub.f32 1.0, %v279_v55 }
 0x166   : > { %908 = vrsqrt.f32 %v359_v14  ;;  %vm390_vm7 = vcmp.eq.f32.partialorder %v359_v14, inf  ;;  %v393_v58 = vand.u32 2147483648, %v359_v14  ;;  %vm392_vm8 = vcmp.eq.f32.partialorder %v359_v14, 0.0 }
 0x167   : > { %910 = vrsqrt.f32 %v358_v15  ;;  %vm383_vm9 = vcmp.eq.f32.partialorder %v358_v15, inf  ;;  %v386_v61 = vand.u32 2147483648, %v358_v15  ;;  %vm385_vm10 = vcmp.eq.f32.partialorder %v358_v15, 0.0 }
 0x168   : > { %v903_v16 = vpop.eup %902 }
 0x169   : > { %v361_v18 = vmul.f32 %v903_v16, %v355_v3 }
 0x16b   : > { %v363_v21 = vsel %vm362_vm1, %v355_v3, %v361_v18  ;;  %v305_v3 = vadd.f32 1.0, %v300_v39  ;;  %v306_v18 = vadd.f32 1.0, %v301_v4 }
 0x16c   : > { %v366_v22 = vsel %vm364_vm2, %v365_v20, %v363_v21  ;;  %v905_v23 = vpop.eup %904 }
 0x16d   : > { %v396_v25 = vadd.f32 %v1117_v17, %v366_v22  ;;  %v907_v28 = vpop.eup %906  ;;  %v375_v33 = vmul.f32 %v905_v23, %v357_v8  ;;  %v310_v13 = vand.u32 2147483647, %v305_v3  ;;  %v304_v22 = vmul.f32 %v1119_v24, %v284_v10  ;;  %v866_v23 = vld [vmem:[%s1313_s1 + $0x2] ss:$0 sm:$0xff] }
 0x16e   : > { %v368_v36 = vmul.f32 %v907_v28, %v356_v9 }
 0x16f   : > { %912 = vrcp.f32 %v396_v25  ;;  %v377_v37 = vsel %vm376_vm3, %v357_v8, %v375_v33  ;;  %v1142_v8 = vrot.slane %v1070_v27, %v1074_v31 }
 0x170   : > { %v380_v43 = vsel %vm378_vm4, %v379_v35, %v377_v37  ;;  %v370_v44 = vsel %vm369_vm5, %v356_v9, %v368_v36  ;;  %v909_v46 = vpop.eup %908 }
 0x171   : > { %v398_v45 = vadd.f32 %v1117_v17, %v380_v43  ;;  %v373_v34 = vsel %vm371_vm6, %v372_v42, %v370_v44  ;;  %v911_v53 = vpop.eup %910  ;;  %v389_v56 = vmul.f32 %v909_v46, %v359_v14 }
 0x172   : > { %v397_v52 = vadd.f32 %v1117_v17, %v373_v34  ;;  %v382_v59 = vmul.f32 %v911_v53, %v358_v15 }
 0x173   : > { %914 = vrcp.f32 %v398_v45  ;;  %v391_v60 = vsel %vm390_vm7, %v359_v14, %v389_v56  ;;  %v307_v14 = vadd.f32 1.0, %v302_v0  ;;  %v309_v45 = vadd.f32 1.0, %v304_v22 }
 0x174   : > { %916 = vrcp.f32 %v397_v52  ;;  %v394_v62 = vsel %vm392_vm8, %v393_v58, %v391_v60  ;;  %v384_v41 = vsel %vm383_vm9, %v358_v15, %v382_v59  ;;  %v303_v15 = vmul.f32 %v1119_v24, %v283_v5 }
 0x175   : > { %v400_v1 = vadd.f32 %v1117_v17, %v394_v62  ;;  %v387_v2 = vsel %vm385_vm10, %v386_v61, %v384_v41  ;;  %v311_v24 = vand.u32 2147483647, %v306_v18  ;;  %v314_v5 = vand.u32 2147483647, %v309_v45 }
 0x176   : > { %v399_v6 = vadd.f32 %v1117_v17, %v387_v2  ;;  %v308_v35 = vadd.f32 1.0, %v303_v15  ;;  %vm789_vm10 = vcmask 0  }
 0x177   : > { %918 = vrcp.f32 %v400_v1 }
 0x178   : > { %920 = vrcp.f32 %v399_v6  ;;  %v313_v1 = vand.u32 2147483647, %v308_v35  ;;  %v867_v35 = vld [vmem:[%s1314_s2 + $0x2] ss:$0 sm:$0xff] }
 0x179   : > { %v913_v48 = vpop.eup %912 }
 0x17a   : > { %v407_v7 = vmul.f32 %v913_v48, %v406_v63  ;;  %v436_v9 = vmul.f32 %v913_v48, %v1117_v17 }
 0x17c   : > { %v1145_v11 = vadd.f32 1.0, %v407_v7  ;;  %v441_v12 = vmul.f32 %v436_v9, %v407_v7  ;;  %v426_v27 = vmul.f32 %v1142_v8, %v407_v7 }
 0x17d   : > { %v915_v16 = vpop.eup %914 }
 0x17e   : > { %v417_v19 = vmul.f32 %v1145_v11, %v1083_v38  ;;  %v446_v20 = vadd.f32 1.0, %v441_v12  ;;  %v917_v21 = vpop.eup %916  ;;  %v409_v25 = vmul.f32 %v915_v16, %v406_v63  ;;  %v438_v28 = vmul.f32 %v915_v16, %v1117_v17 }
 0x17f   : > { %v408_v30 = vmul.f32 %v917_v21, %v406_v63  ;;  %v437_v32 = vmul.f32 %v917_v21, %v1117_v17  ;;  %v312_v38 = vand.u32 2147483647, %v307_v14 }
 0x180   : > { %v1156_v29 = vsub.f32 %v417_v19, %v426_v27  ;;  %v1159_v33 = vmul.f32 %v446_v20, %v310_v13  ;;  %v1161_v36 = vadd.f32 1.0, %v409_v25  ;;  %v443_v37 = vmul.f32 %v438_v28, %v409_v25 }
 0x181   : > { %v1164_v43 = vadd.f32 1.0, %v408_v30  ;;  %v442_v44 = vmul.f32 %v437_v32, %v408_v30  ;;  %v428_v46 = vmul.f32 %v1142_v8, %v409_v25  ;;  %v919_v50 = vpop.eup %918  ;;  %v427_v53 = vmul.f32 %v1142_v8, %v408_v30 }
 0x182   : > { %v469_v42 = vmul.f32 %v866_v23, %v1156_v29  ;;  %v419_v34 = vmul.f32 %v1161_v36, %v1087_v40  ;;  %v448_v39 = vadd.f32 1.0, %v443_v37  ;;  %v921_v55 = vpop.eup %920  ;;  %v411_v58 = vmul.f32 %v919_v50, %v406_v63 }
 0x183   : > { %v418_v52 = vmul.f32 %v1164_v43, %v1096_v47  ;;  %v447_v54 = vadd.f32 1.0, %v442_v44  ;;  %v440_v40 = vmul.f32 %v919_v50, %v1117_v17  ;;  %v410_v61 = vmul.f32 %v921_v55, %v406_v63 }
 0x184   : > { %v474_v51 = vsel %vm248_vm0, %v469_v42, 0.0  ;;  %v1173_v56 = vsub.f32 %v419_v34, %v428_v46  ;;  %v1175_v59 = vmul.f32 %v448_v39, %v312_v38  ;;  %v439_v41 = vmul.f32 %v921_v55, %v1117_v17 }
 0x185   : > { %475 = vadd.xlane.f32.xlu0 %v474_v51  ;;  %v1178_v60 = vsub.f32 %v418_v52, %v427_v53  ;;  %v1180_v62 = vmul.f32 %v447_v54, %v311_v24  ;;  %v1184_v0 = vadd.f32 1.0, %v411_v58  ;;  %v445_v2 = vmul.f32 %v440_v40, %v411_v58 }
 0x186   : > { %v471_v47 = vmul.f32 %v866_v23, %v1173_v56  ;;  %v1187_v3 = vadd.f32 1.0, %v410_v61  ;;  %v444_v4 = vmul.f32 %v439_v41, %v410_v61  ;;  %v430_v7 = vmul.f32 %v1142_v8, %v411_v58 }
 0x187   : > { %v470_v48 = vmul.f32 %v866_v23, %v1178_v60  ;;  %v421_v63 = vmul.f32 %v1184_v0, %v1109_v57  ;;  %v450_v17 = vadd.f32 1.0, %v445_v2  ;;  %v429_v12 = vmul.f32 %v1142_v8, %v410_v61 }
 0x188   : > { %v480_v6 = vsel %vm248_vm0, %v471_v47, 0.0  ;;  %v420_v10 = vmul.f32 %v1187_v3, %v1100_v49  ;;  %v449_v13 = vadd.f32 1.0, %v444_v4  ;;  %v489_v8 = vstv %s864_s17 }
 0x189   : > { %481 = vadd.xlane.f32.xlu0 %v480_v6  ;;  %v477_v9 = vsel %vm248_vm0, %v470_v48, 0.0  ;;  %v1197_v14 = vsub.f32 %v421_v63, %v430_v7  ;;  %v1199_v15 = vmul.f32 %v450_v17, %v314_v5  ;;  %v524_v39 = vstv %s865_s18 }
 0x18a   : > { %478 = vadd.xlane.f32.xlu1 %v477_v9  ;;  %v1201_v16 = vsub.f32 %v420_v10, %v429_v12  ;;  %v1203_v57 = vmul.f32 %v449_v13, %v313_v1 }
 0x18b   : > { %v473_v18 = vmul.f32 %v866_v23, %v1197_v14 }
 0x18c   : > { %v472_v19 = vmul.f32 %v866_v23, %v1201_v16  ;;  %v1212_v23 = vld [vmem:[%s1313_s1 + $0x3] sm:$0x1] }
 0x18d   : > { %v486_v27 = vsel %vm248_vm0, %v473_v18, 0.0  ;;  %v549_v32 = vmul.f32 2.0, %v1212_v23 }
 0x18e   : > { %487 = vadd.xlane.f32.xlu0 %v486_v27  ;;  %v483_v49 = vsel %vm248_vm0, %v472_v19, 0.0 }
 0x18f   : > { %484 = vadd.xlane.f32.xlu1 %v483_v49  ;;  %v553_v46 = vrot.slane %v549_v32, %v1074_v31 }
 0x212   : > { %v476_v20 = vpop.xlane.xlu0 %475 }
 0x213   : > { %v490_v21 = vadd.f32 %v489_v8, %v476_v20 }
 0x215   : > { %922 = vtanh.f32 %v490_v21 }
 0x216   : > { %v482_v22 = vpop.xlane.xlu0 %481 }
 0x217   : > { %v479_v25 = vpop.xlane.xlu1 %478  ;;  %v492_v28 = vadd.f32 %v489_v8, %v482_v22 }
 0x218   : > { %v491_v30 = vadd.f32 %v489_v8, %v479_v25 }
 0x219   : > { %924 = vtanh.f32 %v492_v28 }
 0x21a   : > { %926 = vtanh.f32 %v491_v30 }
 0x21b   : > { %v488_v38 = vpop.xlane.xlu0 %487 }
 0x21c   : > { %v485_v37 = vpop.xlane.xlu1 %484  ;;  %v494_v24 = vadd.f32 %v489_v8, %v488_v38 }
 0x21d   : > { %v493_v44 = vadd.f32 %v489_v8, %v485_v37 }
 0x21e   : > { %928 = vtanh.f32 %v494_v24 }
 0x21f   : > { %v923_v42 = vpop.eup %922  ;;  %930 = vtanh.f32 %v493_v44 }
 0x220   : > { %v500_v45 = vmul.f32 %v923_v42, %v923_v42  ;;  %v514_v34 = vmul.f32 %v923_v42, %v867_v35 }
 0x222   : > { %v505_v50 = vsub.f32 1.0, %v500_v45  ;;  %v1220_v51 = vadd.f32 %v514_v34, %v1156_v29 }
 0x223   : > { %v925_v52 = vpop.eup %924 }
 0x224   : > { %v525_v53 = vmul.f32 %v524_v39, %v505_v50  ;;  %v554_v54 = vsub.f32 %v1220_v51, %v553_v46  ;;  %v927_v55 = vpop.eup %926  ;;  %v502_v58 = vmul.f32 %v925_v52, %v925_v52  ;;  %v516_v40 = vmul.f32 %v925_v52, %v867_v35 }
 0x225   : > { %v501_v61 = vmul.f32 %v927_v55, %v927_v55  ;;  %v515_v47 = vmul.f32 %v927_v55, %v867_v35 }
 0x226   : > { %v559_v41 = vmul.f32 %v554_v54, %v1220_v51  ;;  %v530_v1 = vadd.f32 1.0, %v525_v53  ;;  %v507_v2 = vsub.f32 1.0, %v502_v58  ;;  %v1225_v48 = vadd.f32 %v516_v40, %v1173_v56 }
 0x227   : > { %v506_v4 = vsub.f32 1.0, %v501_v61  ;;  %v1229_v5 = vadd.f32 %v515_v47, %v1178_v60 }
 0x228   : > { %v564_v29 = vsel %vm248_vm0, %v559_v41, 0.0  ;;  %v535_v6 = vand.u32 2147483647, %v530_v1  ;;  %v527_v63 = vmul.f32 %v524_v39, %v507_v2  ;;  %v556_v7 = vsub.f32 %v1225_v48, %v553_v46  ;;  %v929_v17 = vpop.eup %928 }
 0x229   : > { %565 = vadd.xlane.f32.xlu1 %v564_v29  ;;  %v526_v9 = vmul.f32 %v524_v39, %v506_v4  ;;  %v555_v10 = vsub.f32 %v1229_v5, %v553_v46  ;;  %v931_v56 = vpop.eup %930  ;;  %v504_v13 = vmul.f32 %v929_v17, %v929_v17  ;;  %v518_v19 = vmul.f32 %v929_v17, %v867_v35 }
 0x22a   : > { %v1234_v12 = vmul.f32 %v535_v6, %v1159_v33  ;;  %v561_v18 = vmul.f32 %v556_v7, %v1225_v48  ;;  %v532_v27 = vadd.f32 1.0, %v527_v63  ;;  %v503_v60 = vmul.f32 %v931_v56, %v931_v56 }
 0x22b   : > { %v560_v49 = vmul.f32 %v555_v10, %v1229_v5  ;;  %v517_v8 = vmul.f32 %v931_v56, %v867_v35  ;;  %v531_v20 = vadd.f32 1.0, %v526_v9  ;;  %v509_v21 = vsub.f32 1.0, %v504_v13 }
 0x22c   : > { %v570_v22 = vsel %vm248_vm0, %v561_v18, 0.0  ;;  %v1240_v25 = vadd.f32 %v518_v19, %v1197_v14  ;;  %v537_v28 = vand.u32 2147483647, %v532_v27  ;;  %v508_v33 = vsub.f32 1.0, %v503_v60 }
 0x22d   : > { %v567_v30 = vsel %vm248_vm0, %v560_v49, 0.0  ;;  %571 = vadd.xlane.f32.xlu1 %v570_v22  ;;  %v1244_v32 = vadd.f32 %v517_v8, %v1201_v16  ;;  %v536_v38 = vand.u32 2147483647, %v531_v20  ;;  %v529_v24 = vmul.f32 %v524_v39, %v509_v21 }
 0x22e   : > { %568 = vadd.xlane.f32.xlu0 %v567_v30  ;;  %v558_v37 = vsub.f32 %v1240_v25, %v553_v46  ;;  %v1248_v35 = vmul.f32 %v537_v28, %v1175_v59  ;;  %v528_v44 = vmul.f32 %v524_v39, %v508_v33  ;;  %v579_v39 = vstv %s870_s23 }
 0x22f   : > { %v557_v42 = vsub.f32 %v1244_v32, %v553_v46  ;;  %v1252_v14 = vmul.f32 %v536_v38, %v1180_v62  ;;  %v534_v34 = vadd.f32 1.0, %v529_v24  ;;  %v1264_v56 = vstv %s868_s24 }
 0x230   : > { %v563_v45 = vmul.f32 %v558_v37, %v1240_v25  ;;  %v533_v50 = vadd.f32 1.0, %v528_v44 }
 0x231   : > { %v562_v16 = vmul.f32 %v557_v42, %v1244_v32  ;;  %v539_v53 = vand.u32 2147483647, %v534_v34 }
 0x232   : > { %v576_v52 = vsel %vm248_vm0, %v563_v45, 0.0  ;;  %v538_v59 = vand.u32 2147483647, %v533_v50 }
 0x233   : > { %v573_v54 = vsel %vm248_vm0, %v562_v16, 0.0  ;;  %577 = vadd.xlane.f32.xlu1 %v576_v52  ;;  %v1259_v46 = vmul.f32 %v539_v53, %v1199_v15 }
 0x234   : > { %574 = vadd.xlane.f32.xlu0 %v573_v54  ;;  %v1262_v62 = vmul.f32 %v538_v59, %v1203_v57  ;;  %v636_v54 = vstv %s869_s25 }
 0x2b6   : > { %v566_v55 = vpop.xlane.xlu1 %565 }
 0x2b7   : > { %v580_v58 = vadd.f32 %v579_v39, %v566_v55 }
 0x2b9   : > { %v585_v40 = vmax.f32 %v580_v58, 0.0 }
 0x2ba   : > { %v572_v61 = vpop.xlane.xlu1 %571 }
 0x2bb   : > { %932 = vrsqrt.f32 %v585_v40  ;;  %v582_v41 = vadd.f32 %v579_v39, %v572_v61  ;;  %v569_v47 = vpop.xlane.xlu0 %568  ;;  %vm592_vm11 = vcmp.eq.f32.partialorder %v585_v40, inf  ;;  %v595_v10 = vand.u32 2147483648, %v585_v40 }
 0x2bc   : > { %v581_v1 = vadd.f32 %v579_v39, %v569_v47  ;;  %vm594_vm12 = vcmp.eq.f32.partialorder %v585_v40, 0.0  ;;  %v655_v61 = vrot.slane %v1212_v23, %v1074_v31  ;;  %v460_v31 = vand.u32 2147483647, %v1184_v0 }
 0x2bd   : > { %v587_v2 = vmax.f32 %v582_v41, 0.0  ;;  %v459_v23 = vand.u32 2147483647, %v1187_v3 }
 0x2be   : > { %v586_v4 = vmax.f32 %v581_v1, 0.0 }
 0x2bf   : > { %934 = vrsqrt.f32 %v587_v2  ;;  %vm606_vm13 = vcmp.eq.f32.partialorder %v587_v2, inf  ;;  %v609_v8 = vand.u32 2147483648, %v587_v2  ;;  %vm608_vm14 = vcmp.eq.f32.partialorder %v587_v2, 0.0 }
 0x2c0   : > { %936 = vrsqrt.f32 %v586_v4  ;;  %v578_v15 = vpop.xlane.xlu1 %577  ;;  %vm599_vm15 = vcmp.eq.f32.partialorder %v586_v4, inf  ;;  %v602_v22 = vand.u32 2147483648, %v586_v4  ;;  %vm601_vm1 = vcmp.eq.f32.partialorder %v586_v4, 0.0 }
 0x2c1   : > { %v584_v29 = vadd.f32 %v579_v39, %v578_v15  ;;  %v575_v6 = vpop.xlane.xlu0 %574  ;;  %v457_v15 = vand.u32 2147483647, %v1164_v43 }
 0x2c2   : > { %v583_v57 = vadd.f32 %v579_v39, %v575_v6 }
 0x2c3   : > { %v589_v63 = vmax.f32 %v584_v29, 0.0 }
 0x2c4   : > { %v588_v17 = vmax.f32 %v583_v57, 0.0 }
 0x2c5   : > { %v933_v7 = vpop.eup %932  ;;  %938 = vrsqrt.f32 %v589_v63  ;;  %vm620_vm2 = vcmp.eq.f32.partialorder %v589_v63, inf  ;;  %v623_v45 = vand.u32 2147483648, %v589_v63  ;;  %vm622_vm3 = vcmp.eq.f32.partialorder %v589_v63, 0.0 }
 0x2c6   : > { %v591_v9 = vmul.f32 %v933_v7, %v585_v40  ;;  %940 = vrsqrt.f32 %v588_v17  ;;  %vm613_vm4 = vcmp.eq.f32.partialorder %v588_v17, inf  ;;  %v616_v50 = vand.u32 2147483648, %v588_v17 }
 0x2c7   : > { %vm615_vm5 = vcmp.eq.f32.partialorder %v588_v17, 0.0 }
 0x2c8   : > { %v593_v13 = vsel %vm592_vm11, %v585_v40, %v591_v9 }
 0x2c9   : > { %v596_v18 = vsel %vm594_vm12, %v595_v10, %v593_v13  ;;  %v935_v19 = vpop.eup %934 }
 0x2ca   : > { %v626_v27 = vadd.f32 %v1264_v56, %v596_v18  ;;  %v937_v60 = vpop.eup %936  ;;  %v605_v49 = vmul.f32 %v935_v19, %v587_v2 }
 0x2cb   : > { %v598_v20 = vmul.f32 %v937_v60, %v586_v4 }
 0x2cc   : > { %942 = vrcp.f32 %v626_v27  ;;  %v607_v21 = vsel %vm606_vm13, %v587_v2, %v605_v49  ;;  %v456_v2 = vand.u32 2147483647, %v1145_v11 }
 0x2cd   : > { %v610_v28 = vsel %vm608_vm14, %v609_v8, %v607_v21  ;;  %v600_v33 = vsel %vm599_vm15, %v586_v4, %v598_v20  ;;  %v458_v4 = vand.u32 2147483647, %v1161_v36 }
 0x2ce   : > { %v603_v30 = vsel %vm601_vm1, %v602_v22, %v600_v33  ;;  %v628_v38 = vadd.f32 %v1264_v56, %v610_v28 }
 0x2cf   : > { %v939_v37 = vpop.eup %938  ;;  %v627_v24 = vadd.f32 %v1264_v56, %v603_v30 }
 0x2d0   : > { %v941_v42 = vpop.eup %940  ;;  %v619_v44 = vmul.f32 %v939_v37, %v589_v63  ;;  %944 = vrcp.f32 %v628_v38 }
 0x2d1   : > { %v612_v34 = vmul.f32 %v941_v42, %v588_v17  ;;  %946 = vrcp.f32 %v627_v24 }
 0x2d2   : > { %v621_v16 = vsel %vm620_vm2, %v589_v63, %v619_v44 }
 0x2d3   : > { %v624_v52 = vsel %vm622_vm3, %v623_v45, %v621_v16  ;;  %v614_v53 = vsel %vm613_vm4, %v588_v17, %v612_v34 }
 0x2d4   : > { %v617_v59 = vsel %vm615_vm5, %v616_v50, %v614_v53  ;;  %v630_v39 = vadd.f32 %v1264_v56, %v624_v52 }
 0x2d5   : > { %v629_v58 = vadd.f32 %v1264_v56, %v617_v59 }
 0x2d6   : > { %v943_v55 = vpop.eup %942  ;;  %948 = vrcp.f32 %v630_v39 }
 0x2d7   : > { %v637_v40 = vmul.f32 %v943_v55, %v636_v54  ;;  %v666_v41 = vmul.f32 %v943_v55, %v1264_v56  ;;  %950 = vrcp.f32 %v629_v58 }
 0x2d9   : > { %v642_v47 = vadd.f32 1.0, %v637_v40  ;;  %v671_v1 = vmul.f32 %v666_v41, %v637_v40  ;;  %v656_v57 = vmul.f32 %v655_v61, %v637_v40 }
 0x2da   : > { %v945_v29 = vpop.eup %944 }
 0x2db   : > { %v647_v6 = vmul.f32 %v642_v47, %v1220_v51  ;;  %v686_v63 = vand.u32 2147483647, %v642_v47  ;;  %v676_v7 = vadd.f32 1.0, %v671_v1  ;;  %v947_v17 = vpop.eup %946  ;;  %v639_v9 = vmul.f32 %v945_v29, %v636_v54 }
 0x2dc   : > { %v668_v10 = vmul.f32 %v945_v29, %v1264_v56  ;;  %v638_v11 = vmul.f32 %v947_v17, %v636_v54  ;;  %v667_v51 = vmul.f32 %v947_v17, %v1264_v56 }
 0x2dd   : > { %v661_v13 = vsub.f32 %v647_v6, %v656_v57  ;;  %v681_v36 = vmul.f32 %v676_v7, %v1234_v12  ;;  %v691_v18 = vmul.f32 %v686_v63, %v456_v2  ;;  %v644_v43 = vadd.f32 1.0, %v639_v9 }
 0x2de   : > { %v658_v19 = vmul.f32 %v655_v61, %v639_v9  ;;  %v673_v27 = vmul.f32 %v668_v10, %v639_v9  ;;  %v643_v49 = vadd.f32 1.0, %v638_v11  ;;  %v657_v8 = vmul.f32 %v655_v61, %v638_v11 }
 0x2df   : > { %v726_v60 = vmul.f32 %v661_v13, %v661_v13  ;;  %952 = vlog2.f32 %v681_v36  ;;  %v649_v0 = vmul.f32 %v644_v43, %v1225_v48  ;;  %v688_v3 = vand.u32 2147483647, %v644_v43 }
 0x2e0   : > { %954 = vlog2.f32 %v691_v18  ;;  %v672_v20 = vmul.f32 %v667_v51, %v638_v11  ;;  %v949_v21 = vpop.eup %948  ;;  %v648_v12 = vmul.f32 %v643_v49, %v1229_v5  ;;  %v687_v28 = vand.u32 2147483647, %v643_v49 }
 0x2e1   : > { %v731_v22 = vsel %vm248_vm0, %v726_v60, 0.0  ;;  %v678_v33 = vadd.f32 1.0, %v673_v27  ;;  %v951_v30 = vpop.eup %950  ;;  %v663_v38 = vsub.f32 %v649_v0, %v658_v19  ;;  %v641_v37 = vmul.f32 %v949_v21, %v636_v54 }
 0x2e2   : > { %732 = vadd.xlane.f32.xlu0 %v731_v22  ;;  %v677_v24 = vadd.f32 1.0, %v672_v20  ;;  %v693_v42 = vmul.f32 %v688_v3, %v458_v4  ;;  %v662_v44 = vsub.f32 %v648_v12, %v657_v8  ;;  %v640_v45 = vmul.f32 %v951_v30, %v636_v54 }
 0x2e3   : > { %v692_v34 = vmul.f32 %v687_v28, %v457_v15  ;;  %v683_v48 = vmul.f32 %v678_v33, %v1248_v35  ;;  %v728_v16 = vmul.f32 %v663_v38, %v663_v38  ;;  %v646_v50 = vadd.f32 1.0, %v641_v37 }
 0x2e4   : > { %v660_v52 = vmul.f32 %v655_v61, %v641_v37  ;;  %v682_v53 = vmul.f32 %v677_v24, %v1252_v14  ;;  %v727_v59 = vmul.f32 %v662_v44, %v662_v44  ;;  %v645_v5 = vadd.f32 1.0, %v640_v45 }
 0x2e5   : > { %v659_v39 = vmul.f32 %v655_v61, %v640_v45  ;;  %956 = vlog2.f32 %v692_v34  ;;  %v737_v55 = vsel %vm248_vm0, %v728_v16, 0.0  ;;  %v651_v58 = vmul.f32 %v646_v50, %v1240_v25 }
 0x2e6   : > { %v690_v40 = vand.u32 2147483647, %v646_v50  ;;  %958 = vlog2.f32 %v682_v53  ;;  %738 = vadd.xlane.f32.xlu0 %v737_v55  ;;  %v734_v54 = vsel %vm248_vm0, %v727_v59, 0.0  ;;  %v650_v35 = vmul.f32 %v645_v5, %v1244_v32 }
 0x2e7   : > { %v689_v41 = vand.u32 2147483647, %v645_v5  ;;  %960 = vlog2.f32 %v683_v48  ;;  %735 = vadd.xlane.f32.xlu1 %v734_v54  ;;  %v665_v47 = vsub.f32 %v651_v58, %v660_v52  ;;  %v669_v14 = vmul.f32 %v951_v30, %v1264_v56 }
 0x2e8   : > { %962 = vlog2.f32 %v693_v42  ;;  %v670_v61 = vmul.f32 %v949_v21, %v1264_v56  ;;  %v664_v2 = vsub.f32 %v650_v35, %v659_v39  ;;  %v695_v25 = vmul.f32 %v690_v40, %v460_v31 }
 0x2e9   : > { %v953_v1 = vpop.eup %952  ;;  %v694_v4 = vmul.f32 %v689_v41, %v459_v23  ;;  %v730_v29 = vmul.f32 %v665_v47, %v665_v47  ;;  %v674_v6 = vmul.f32 %v669_v14, %v640_v45  ;;  %v759_v45 = vadd.s32 8, %v1065_v26 }
 0x2ea   : > { %v955_v15 = vpop.eup %954  ;;  %v675_v57 = vmul.f32 %v670_v61, %v641_v37  ;;  %v729_v63 = vmul.f32 %v664_v2, %v664_v2  ;;  %v697_v56 = vmul.f32 0.6931472, %v953_v1  ;;  %v763_v34 = vstv %s756_s26 }
 0x2eb   : > { %v707_v7 = vmul.f32 0.6931472, %v955_v15  ;;  %964 = vlog2.f32 %v694_v4  ;;  %v743_v32 = vsel %vm248_vm0, %v730_v29, 0.0  ;;  %v679_v17 = vadd.f32 1.0, %v674_v6 }
 0x2ec   : > { %v680_v9 = vadd.f32 1.0, %v675_v57  ;;  %966 = vlog2.f32 %v695_v25  ;;  %744 = vadd.xlane.f32.xlu0 %v743_v32  ;;  %v740_v10 = vsel %vm248_vm0, %v729_v63, 0.0  ;;  %v760_v48 = vadd.s32 16, %v1065_v26 }
 0x2ed   : > { %v716_v13 = vmul.f32 15.0, %v707_v7  ;;  %741 = vadd.xlane.f32.xlu1 %v740_v10  ;;  %v684_v31 = vmul.f32 %v679_v17, %v1262_v62  ;;  %v764_v50 = vadd.s32 %v763_v34, %v1065_v26  ;;  %v765_v52 = vadd.s32 %v763_v34, %v759_v45 }
 0x2ee   : > { %v685_v23 = vmul.f32 %v680_v9, %v1259_v46  ;;  %v766_v5 = vadd.s32 %v763_v34, %v760_v48  ;;  %v761_v55 = vadd.s32 24, %v1065_v26  ;;  %v762_v54 = vadd.s32 32, %v1065_v26 }
 0x2ef   : > { %v957_v11 = vpop.eup %956  ;;  %v721_v36 = vadd.f32 %v716_v13, %v697_v56  ;;  %968 = vlog2.f32 %v684_v31  ;;  %vm769_vm0 = vcmp.lt.s32.totalorder %v764_v50, 300  ;;  %vm770_vm6 = vcmp.lt.s32.totalorder %v765_v52, 300 }
 0x2f0   : > { %v959_v18 = vpop.eup %958  ;;  %v709_v43 = vmul.f32 0.6931472, %v957_v11  ;;  %970 = vlog2.f32 %v685_v23  ;;  %vm771_vm7 = vcmp.lt.s32.totalorder %v766_v5, 300  ;;  %v767_v47 = vadd.s32 %v763_v34, %v761_v55 }
 0x2f1   : > { %v961_v19 = vpop.eup %960  ;;  %v699_v27 = vmul.f32 0.6931472, %v959_v18  ;;  %v768_v25 = vadd.s32 %v763_v34, %v762_v54 }
 0x2f2   : > { %v963_v51 = vpop.eup %962  ;;  %v717_v60 = vmul.f32 15.0, %v709_v43  ;;  %v701_v3 = vmul.f32 0.6931472, %v961_v19  ;;  %vm772_vm8 = vcmp.lt.s32.totalorder %v767_v47, 300 }
 0x2f3   : > { %v711_v49 = vmul.f32 0.6931472, %v963_v51  ;;  %vm773_vm9 = vcmp.lt.s32.totalorder %v768_v25, 300 }
 0x2f4   : > { %v722_v8 = vadd.f32 %v717_v60, %v699_v27 }
 0x2f5   : > { %v965_v0 = vpop.eup %964  ;;  %v718_v20 = vmul.f32 15.0, %v711_v49 }
 0x2f6   : > { %v967_v21 = vpop.eup %966  ;;  %v713_v62 = vmul.f32 0.6931472, %v965_v0 }
 0x2f7   : > { %v723_v22 = vadd.f32 %v718_v20, %v701_v3  ;;  %v715_v46 = vmul.f32 0.6931472, %v967_v21 }
 0x2f8   : > { %v719_v12 = vmul.f32 15.0, %v713_v62 }
 0x2f9   : > { %v969_v28 = vpop.eup %968  ;;  %v720_v33 = vmul.f32 15.0, %v715_v46 }
 0x2fa   : > { %v971_v30 = vpop.eup %970  ;;  %v703_v38 = vmul.f32 0.6931472, %v969_v28 }
 0x2fb   : > { %v705_v37 = vmul.f32 0.6931472, %v971_v30 }
 0x2fc   : > { %v724_v24 = vadd.f32 %v719_v12, %v703_v38 }
 0x2fd   : > { %v725_v42 = vadd.f32 %v720_v33, %v705_v37 }
 0x36f   : > { %v733_v44 = vpop.xlane.xlu0 %732 }
 0x370   : > { %v746_v16 = vmul.f32 0.5, %v733_v44 }
 0x372   : > { %v751_v58 = vsub.f32 %v721_v36, %v746_v16 }
 0x373   : > { %v739_v53 = vpop.xlane.xlu0 %738 }
 0x374   : > { %v736_v59 = vpop.xlane.xlu1 %735  ;;  %v748_v39 = vmul.f32 0.5, %v739_v53  ;;  %v774_v14 = vsel %vm769_vm0, %v751_v58, 0.0 }
 0x375   : > { %v747_v40 = vmul.f32 0.5, %v736_v59 }
 0x376   : > { %v753_v41 = vsub.f32 %v723_v22, %v748_v39 }
 0x377   : > { %v752_v35 = vsub.f32 %v722_v8, %v747_v40 }
 0x378   : > { %v776_v29 = vsel %vm771_vm7, %v753_v41, 0.0 }
 0x379   : > { %v775_v61 = vsel %vm770_vm6, %v752_v35, 0.0  ;;  %v745_v1 = vpop.xlane.xlu0 %744 }
 0x37a   : > { %v779_v2 = vadd.f32 %v775_v61, %v774_v14  ;;  %v742_v4 = vpop.xlane.xlu1 %741  ;;  %v750_v15 = vmul.f32 0.5, %v745_v1 }
 0x37b   : > { %v749_v6 = vmul.f32 0.5, %v742_v4 }
 0x37c   : > { %v780_v57 = vadd.f32 %v779_v2, %v776_v29  ;;  %v755_v7 = vsub.f32 %v725_v42, %v750_v15 }
 0x37d   : > { %v754_v63 = vsub.f32 %v724_v24, %v749_v6 }
 0x37e   : > { %v778_v17 = vsel %vm773_vm9, %v755_v7, 0.0 }
 0x37f   : > { %v777_v26 = vsel %vm772_vm8, %v754_v63, 0.0 }
 0x380   : > { %v781_v32 = vadd.f32 %v780_v57, %v777_v26 }
 0x382   : > { %v782_v9 = vadd.f32 %v781_v32, %v778_v17 }
 0x384   : > { %v783_v10 = vrot.slane %v782_v9, 4 }
 0x386   : > { %v784_v56 = vadd.f32 %v783_v10, %v782_v9 }
 0x388   : > { %v785_v13 = vrot.slane %v784_v56, 2 }
 0x38a   : > { %v786_v31 = vadd.f32 %v785_v13, %v784_v56 }
 0x38c   : > { %v787_v23 = vrot.slane %v786_v31, 1 }
 0x38e   : > { %v788_v11 = vadd.f32 %v787_v23, %v786_v31 }
 0x390   : > { %790 = vst.msk [vmem:[%s229_s29] sm:$0x1] %vm789_vm10, %v788_v11 }
 0x391 PF: > { %s15_s15 = sadd.s32 1, %s997_s15  }
 0x392   : > { %p12_p2 = scmp.ge.s32.totalorder %s15_s15, 10  }
 0x394   :  { %14 = sbr.rel (!%p12_p2) target bundleno = 1 (0x1), region = 71 }
 0x39b   :  { %808 = vsyncpa [#allocation3], 1 }
 0x39c   :  { %810 = vsyncpa [#allocation3 + $0x1], 1 }

</bundles_post_ra>
